<compile_context>
chip_gen: v6e
topology: v6e:2x2x1
jax: 0.10.0
libtpu: 0.0.40
codegen_flags: <defaults>
</compile_context>

<pallas_src>
import jax
import jax.numpy as jnp
from jax.experimental import pallas as pl
from jax.experimental.pallas import tpu as pltpu


# ---------------------------------------------------------------------------
# Kernels
# ---------------------------------------------------------------------------
def _linear_kernel(x_ref, wt_ref, b_ref, o_ref):
    """Z_tile = X_tile @ W^T + b ; whole feature dim in a single MXU pass."""
    acc = jnp.dot(x_ref[...], wt_ref[...], preferred_element_type=jnp.float32)
    o_ref[...] = (acc + b_ref[...].astype(jnp.float32)).astype(o_ref.dtype)


def _linear_kernel_ktiled(x_ref, wt_ref, b_ref, o_ref, acc_ref):
    """Feature (K) dim streamed over the last grid axis; f32 VMEM accumulator."""
    k = pl.program_id(1)

    @pl.when(k == 0)
    def _():
        acc_ref[...] = jnp.zeros_like(acc_ref)

    acc_ref[...] += jnp.dot(x_ref[...], wt_ref[...],
                            preferred_element_type=jnp.float32)

    @pl.when(k == pl.num_programs(1) - 1)
    def _():
        o_ref[...] = (acc_ref[...] + b_ref[...].astype(jnp.float32)).astype(o_ref.dtype)


# ---------------------------------------------------------------------------
# One-time parameter layout prep + tile sizing
# ---------------------------------------------------------------------------
def prepare_params(weight, bias, dtype=None):
    """weight: (C, F) PyTorch Linear layout; bias: (C,).

    Returns wt: (F, C), bias2d: (1, C).  Optionally cast wt to bf16 (and cast X
    the same way at the call site) to halve the HBM stream on v6e/v7x; the MXU
    still accumulates in f32 and bias stays f32.
    """
    wt = jnp.asarray(weight).T
    b2d = jnp.asarray(bias).reshape(1, -1)
    if dtype is not None:
        wt = wt.astype(dtype)
    return wt, b2d


def _vmem_budget_and_limit():
    """Generation-aware VMEM numbers (per TensorCore).

    ~128 MiB on v5e/v6e (1 TC/chip), 64 MiB per TC on v7x (each TC runs its own
    slice of the "parallel" batch axis with its own resident weight copy).
    """
    try:
        cap = int(pltpu.get_tpu_info().vmem_capacity_bytes)
    except Exception:  # info unavailable -> assume the smallest (v7x per-TC)
        cap = 64 * 1024 * 1024
    budget = (cap * 3) // 4   # tile-sizing budget (~96 MiB v5e/v6e, ~48 MiB v7x)
    limit = (cap * 7) // 8    # scoped VMEM limit handed to Mosaic
    return budget, limit


_TM_CANDIDATES = (8192, 4096, 2048, 1024, 512, 256, 128)
_TK_CANDIDATES = (4096, 2048, 1024, 512, 256, 128)


def _choose_tiles(batch, num_features, num_classes, in_itemsize, out_itemsize,
                  budget_bytes):
    """Pick (tm, tk, nk).  nk == 1 -> weight fully VMEM-resident, no K axis.

    Counts the default double buffer on every operand (including the
    constant-index W^T / bias blocks) so the real allocation stays under
    vmem_limit_bytes.
    """
    c_in = num_classes * in_itemsize
    full_w = 2 * num_features * c_in + 2 * c_in          # W^T + bias, x2 buffers
    if full_w <= budget_bytes // 2:
        tk, nk, w_bytes = num_features, 1, full_w
    else:
        tk = None
        for cand in _TK_CANDIDATES:
            if num_features % cand == 0 and (2 * cand * c_in + 2 * c_in) <= budget_bytes // 2:
                tk = cand
                break
        if tk is None:
            raise ValueError(
                "LogisticRegression Pallas kernel: the (F, C) weight block does not "
                f"fit the VMEM budget (F={num_features}, C={num_classes}, "
                f"budget={budget_bytes}B) and F is not divisible by a 128-multiple "
                "K tile; pad num_features to a multiple of 128.")
        nk = num_features // tk
        w_bytes = 2 * tk * c_in + 2 * c_in
    remaining = budget_bytes - w_bytes

    def step_bytes(tm):
        b = 2 * tm * tk * in_itemsize              # X tile (double-buffered)
        b += 2 * tm * num_classes * out_itemsize   # out tile (double-buffered)
        if nk > 1:
            b += tm * num_classes * 4              # f32 accumulator scratch
        return b

    cands = (batch,) if batch <= 128 else tuple(t for t in _TM_CANDIDATES if t <= batch)
    for tm in cands:
        if step_bytes(tm) <= remaining:
            return tm, tk, nk
    raise ValueError(
        "LogisticRegression Pallas kernel: no batch tile fits the VMEM budget "
        f"(B={batch}, F={num_features}, C={num_classes}, budget={budget_bytes}B).")


# ---------------------------------------------------------------------------
# Forward
# ---------------------------------------------------------------------------
def logistic_regression_forward(x, wt, bias2d, *, vmem_budget_bytes=None):
    """Z = x @ weight.T + bias as one Pallas call.  x: (B, F), wt: (F, C)."""
    B, F = x.shape
    Fw, C = wt.shape
    assert Fw == F, "feature dim mismatch between x and weight"
    assert bias2d.shape == (1, C)

    budget, vmem_limit = _vmem_budget_and_limit()
    if vmem_budget_bytes is not None:
        budget = min(budget, int(vmem_budget_bytes))
    tm, tk, nk = _choose_tiles(B, F, C, x.dtype.itemsize, x.dtype.itemsize, budget)
    nb = pl.cdiv(B, tm)

    cost = pl.CostEstimate(
        flops=2 * B * F * C,
        transcendentals=0,
        bytes_accessed=x.dtype.itemsize * (B * F + F * C * (1 if nk == 1 else nb)
                                           + C + B * C),
    )

    if nk == 1:
        grid = (nb,)
        kernel = _linear_kernel
        in_specs = [
            pl.BlockSpec((tm, F), lambda i: (i, 0)),    # X batch tile (streamed)
            pl.BlockSpec((F, C), lambda i: (0, 0)),     # W^T, VMEM-resident
            pl.BlockSpec((1, C), lambda i: (0, 0)),     # bias, VMEM-resident
        ]
        out_spec = pl.BlockSpec((tm, C), lambda i: (i, 0))
        scratch = ()
        dims = ("parallel",)
    else:
        grid = (nb, nk)                                  # reduction (K) axis last
        kernel = _linear_kernel_ktiled
        in_specs = [
            pl.BlockSpec((tm, tk), lambda i, k: (i, k)),
            pl.BlockSpec((tk, C), lambda i, k: (k, 0)),
            pl.BlockSpec((1, C), lambda i, k: (0, 0)),
        ]
        out_spec = pl.BlockSpec((tm, C), lambda i, k: (i, 0))
        scratch = (pltpu.VMEM((tm, C), jnp.float32),)
        dims = ("parallel", "arbitrary")

    # TODO(synk): sweep pipeline_mode=pl.Buffered(1) on W^T/bias and Buffered(3)
    # on the X stream once an xprof trace of the target shapes is available.
    return pl.pallas_call(
        kernel,
        out_shape=jax.ShapeDtypeStruct((B, C), x.dtype),
        grid_spec=pltpu.PrefetchScalarGridSpec(
            num_scalar_prefetch=0,
            grid=grid,
            in_specs=in_specs,
            out_specs=out_spec,
            scratch_shapes=scratch,
        ),
        compiler_params=pltpu.CompilerParams(
            dimension_semantics=dims,
            vmem_limit_bytes=vmem_limit,
        ),
        cost_estimate=cost,
    )(x, wt, bias2d)


# ---------------------------------------------------------------------------
# Deterministic demo / self-check
# ---------------------------------------------------------------------------
def xavier_uniform(key, shape, dtype=jnp.float32):
    # Matches torch.nn.init.xavier_uniform_ for a 2-D (fan_out, fan_in) weight.
    fan_out, fan_in = shape
    limit = (6.0 / (fan_in + fan_out)) ** 0.5
    return jax.random.uniform(key, shape, dtype=dtype, minval=-limit, maxval=limit)


def _make_case(key, batch, num_features, num_classes):
    k_x, k_w, k_b = jax.random.split(key, 3)
    weight = xavier_uniform(k_w, (num_classes, num_features))   # fc.weight (C, F)
    bound = 1.0 / (num_features ** 0.5)                         # torch default bias init
    bias = jax.random.uniform(k_b, (num_classes,), minval=-bound, maxval=bound)
    x = jax.random.normal(k_x, (batch, num_features), dtype=jnp.float32)
    return x, weight, bias


if __name__ == "__main__":
    k0, k1, k2 = jax.random.split(jax.random.PRNGKey(0), 3)

    # Case 1: module-sized small shapes — single tile, weight VMEM-resident.
    x, w, b = _make_case(k0, batch=8, num_features=32, num_classes=16)
    wt, b2d = prepare_params(w, b)          # init-time transpose, done once
    z = logistic_regression_forward(x, wt, b2d)
    jax.block_until_ready(z)
    z_ref = x @ w.T + b
    assert z.shape == (8, 16)
    assert jnp.allclose(z, z_ref, atol=1e-5, rtol=1e-5)

    # Case 2: ragged batch (B % tm != 0) — exercises the masked output writeback.
    x2, w2, b2 = _make_case(k1, batch=300, num_features=32, num_classes=16)
    wt2, b2d2 = prepare_params(w2, b2)
    z2 = logistic_regression_forward(x2, wt2, b2d2)
    jax.block_until_ready(z2)
    assert jnp.allclose(z2, x2 @ w2.T + b2, atol=1e-4, rtol=1e-5)

    # Case 3: artificially small budget forces the K-tiled (feature-reduction)
    # accumulator path that large-F models hit first on v7x (64 MiB VMEM/TC).
    x3, w3, b3 = _make_case(k2, batch=128, num_features=512, num_classes=128)
    wt3, b2d3 = prepare_params(w3, b3)
    z3 = logistic_regression_forward(x3, wt3, b2d3, vmem_budget_bytes=768 * 1024)
    jax.block_until_ready(z3)
    assert jnp.allclose(z3, x3 @ w3.T + b3, atol=1e-4, rtol=1e-4)

    print("KERNEL_OK")
</pallas_src>

<mosaic_0001>
module attributes {stable_mosaic.version = 11 : i64} {
  func.func @_linear_kernel(%arg0: i32, %arg1: memref<8x32xf32, #tpu.memory_space<vmem>>, %arg2: memref<32x16xf32, #tpu.memory_space<vmem>>, %arg3: memref<1x16xf32, #tpu.memory_space<vmem>>, %arg4: memref<8x16xf32, #tpu.memory_space<vmem>>) attributes {dimension_semantics = [#tpu.dimension_semantics<parallel>], iteration_bounds = array<i64: 1>, scalar_prefetch = 0 : i64, scratch_operands = 0 : i64, tpu.core_type = #tpu.core_type<tc>, window_params = [{transform_indices = @transform_0, window_bounds = array<i64: 8, 32>}, {pipeline_mode = #tpu.pipeline_mode<synchronous>, transform_indices = @transform_1, window_bounds = array<i64: 32, 16>}, {pipeline_mode = #tpu.pipeline_mode<synchronous>, transform_indices = @transform_2, window_bounds = array<i64: 1, 16>}, {transform_indices = @transform_3, window_bounds = array<i64: 8, 16>}]} {
    %c0 = arith.constant 0 : index
    %c0_0 = arith.constant 0 : index
    %0 = vector.load %arg1[%c0, %c0_0] : memref<8x32xf32, #tpu.memory_space<vmem>>, vector<8x32xf32>
    %c0_1 = arith.constant 0 : index
    %c0_2 = arith.constant 0 : index
    %1 = vector.load %arg2[%c0_1, %c0_2] : memref<32x16xf32, #tpu.memory_space<vmem>>, vector<32x16xf32>
    %cst = arith.constant dense<0.000000e+00> : vector<8x16xf32>
    %2 = tpu.matmul %0, %1, %cst {dimension_numbers = #tpu.dot_dimension_numbers<[1], [0], [0], [1], [0, 0, 1, 1], [], []>} : vector<8x32xf32>, vector<32x16xf32>, vector<8x16xf32> -> vector<8x16xf32>
    %c0_3 = arith.constant 0 : index
    %c0_4 = arith.constant 0 : index
    %3 = vector.load %arg3[%c0_3, %c0_4] : memref<1x16xf32, #tpu.memory_space<vmem>>, vector<1x16xf32>
    %4 = vector.broadcast %3 : vector<1x16xf32> to vector<8x16xf32>
    %5 = arith.addf %2, %4 : vector<8x16xf32>
    %c0_5 = arith.constant 0 : index
    %c0_6 = arith.constant 0 : index
    %6 = vector.load %arg4[%c0_5, %c0_6] : memref<8x16xf32, #tpu.memory_space<vmem>>, vector<8x16xf32>
    tpu.vector_store %arg4[%c0_5, %c0_6], %5 {strides = array<i32>} : memref<8x16xf32, #tpu.memory_space<vmem>>, vector<8x16xf32>,
    return
  }
  func.func @transform_0(%arg0: i32) -> (i32, i32) {
    %c0_i32 = arith.constant 0 : i32
    %c0_i32_0 = arith.constant 0 : i32
    return %arg0, %c0_i32 : i32, i32
  }
  func.func @transform_1(%arg0: i32) -> (i32, i32) {
    %c0_i32 = arith.constant 0 : i32
    %c0_i32_0 = arith.constant 0 : i32
    %c0_i32_1 = arith.constant 0 : i32
    return %c0_i32, %c0_i32_0 : i32, i32
  }
  func.func @transform_2(%arg0: i32) -> (i32, i32) {
    %c0_i32 = arith.constant 0 : i32
    %c0_i32_0 = arith.constant 0 : i32
    %c0_i32_1 = arith.constant 0 : i32
    return %c0_i32, %c0_i32_0 : i32, i32
  }
  func.func @transform_3(%arg0: i32) -> (i32, i32) {
    %c0_i32 = arith.constant 0 : i32
    %c0_i32_0 = arith.constant 0 : i32
    return %arg0, %c0_i32 : i32, i32
  }
}

</mosaic_0001>

<bundles_post_ra>
// kernel: tpu_custom_call.1
= control target key start
LH: loop header
LB: loop body
LE: loop exit
PB: predicated region body
PF: predicated region fallthrough
CT: control target
= control target key end

     0   :  { %v160_v1 = vmov 0.0   ;;  %vm161_vm0 = vmmov 0   ;;  %s204_s0 = inlined_call_operand.vmem [shape: f32[8,32], index: 0, kind: input, shape index: {}]   ;;  %s205_s1 = inlined_call_operand.vmem [shape: f32[32,16], index: 1, kind: input, shape index: {}]   ;;  %s206_s2 = inlined_call_operand.vmem [shape: f32[1,16], index: 2, kind: input, shape index: {}]   ;;  %s207_s3 = inlined_call_operand.hbm [shape: f32[8,16], index: 3, kind: output, shape index: {}]  }
   0x1   :  { %v19_v0 = vld [vmem:[%s205_s1 + $0x18] sm:$0xff]  ;;  %124 = vmatprep.subr.mxu0 %v160_v1  ;;  %v18_v2 = vld [vmem:[%s205_s1 + $0x10] sm:$0xff]  ;;  %132 = vmatprep.mubr.msk.f32.mxu0 %vm161_vm0, %v160_v1 }
   0x2   :  { %125 = vmatpush3.msra.mxu0 %v19_v0 }
   0x3   :  { %8 = vsyncpa [#allocation3], 0  ;;  %126 = vmatprep.subr.mxu0 %v160_v1  ;;  %v17_v3 = vld [vmem:[%s205_s1 + $0x8] sm:$0xff]  ;;  %v16_v4 = vld [vmem:[%s205_s1] sm:$0xff]  ;;  %vm27_vm1 = vcmask 261120   ;;  %s162_s24 = smov [#allocation2]  }
   0x4   :  { %127 = vmatpush3.msra.mxu0 %v18_v2  ;;  %v15_v5 = vld [vmem:[%s204_s0] sm:$0xff]  ;;  %s109_s25 = sshll.u32 %s162_s24, 4  ;;  %vm101_vm2 = vcmask 130048   ;;  %s110_s25 = int_to_ptr.vmem [resolvable:$true] %s109_s25 }
   0x5   :  { %128 = vmatprep.subr.mxu0 %v160_v1  ;;  %v117_v6 = vld [vmem:[%s206_s2] ss:$0 sm:$0xff]  ;;  %s138_s1 = scalar_lea.vmem %s110_s25, 128  ;;  %p143_p1 = scmp.lt.s32.totalorder %s110_s25, %s110_s25 }
   0x6   :  { %129 = vmatpush3.msra.mxu0 %v17_v3  ;;  %p139_p0 = scmp.ne.s32.totalorder %s110_s25, %s138_s1  ;;  %p144_p2 = scmp.lt.s32.totalorder %s138_s1, %s138_s1 }
   0x7   :  { %130 = vmatprep.subr.mxu0 %v160_v1 }
   0x8   :  { %131 = vmatpush3.msra.mxu0 %v16_v4  ;;  %p145_p3 = por %p144_p2, %p143_p1 }
   0x9   :  { %133 = vmatmul.mubr.msk.f32.vlgmr.msra.gmra.mxu0 %vm27_vm1, %v15_v5 }
   0xa   :  { %p146_p4 = pnand %p145_p3, %p139_p0 }
  0xc9   :  { %v97_v7 = vpop.f32.mrf.mxu0 }
  0xca   :  { %v98_v8 = vadd.f32 %v117_v6, %v97_v7 }
  0xcb   :  { %v134_v9 = vpop.f32.mrf.mxu0 }
  0xcc   :  { %102 = vst.msk [vmem:[#allocation2] sm:$0xff] %vm101_vm2, %v98_v8 }
  0xcd   :  { %149 = shalt.err (!%p146_p4)
}
  0xce   :  { %112 = dma.vmem_to_hbm [thread:$0]  %s110_s25, 128, %s207_s3, [#allocation3]  }
  0xcf   :  { %158 = dma.done.wait [#allocation3], 128  }
  0xd0   :  { %159 = vsyncadd [#allocation3], 4294967168 }
  0xd1   :  { %116 = vsyncpa [#allocation3], 1 }

</bundles_post_ra>
